<compile_context>
chip_gen: v6e
topology: v6e:2x2x1
jax: 0.10.0
libtpu: 0.0.40
codegen_flags: <defaults>
</compile_context>

<pallas_src>
import math

import jax
import jax.numpy as jnp
from jax import lax
from jax.experimental import pallas as pl
from jax.experimental.pallas import tpu as pltpu


def sent_cls_kernel(x_ref, m3_ref, m2_ref, pos_ref, gamma_ref, beta_ref,
                    w_ref, b_ref, out_ref):
    # x_ref:     (TB, N, D)  sentence vectors (batch tile)
    # m3_ref:    (TB, N, 1)  mask, broadcast over D (lane splat, no relayout)
    # m2_ref:    (TB, N)     mask, lane-dense, for the output-side multiply
    # pos_ref:   (N, D)      pe[:, :N]          (pinned across the batch grid)
    # gamma/beta (1, D)      LayerNorm affine   (pinned)
    # w_ref:     (1, D)      wo.weight          (pinned)
    # b_ref:     (1,)        wo.bias scalar in SMEM
    # out_ref:   (TB, N)     sent_scores (lane-dense: N on the lane axis)
    x = x_ref[...] * m3_ref[...] + pos_ref[...][None, :, :]

    # LayerNorm over d_model (eps = 1e-6) with affine params.
    mu = jnp.mean(x, axis=-1, keepdims=True)
    var = jnp.mean(jnp.square(x - mu), axis=-1, keepdims=True)
    xn = (x - mu) * lax.rsqrt(var + 1e-6)
    xn = xn * gamma_ref[...][None, :, :] + beta_ref[...][None, :, :]

    # wo: Linear(d_model -> 1).  Keep the D->1 projection on VPU/XLU
    # (elementwise mul + lane reduction) rather than wasting the MXU.
    s = jnp.sum(xn * w_ref[...][None, :, :], axis=-1) + b_ref[0]   # (TB, N)

    # sigmoid, then sent_scores = probs * mask (lane-dense store).
    out_ref[...] = jax.nn.sigmoid(s) * m2_ref[...]


def _pick_batch_tile(batch, n, d, vmem_budget_bytes=8 << 20):
    """Largest batch tile that (a) divides B, (b) is a multiple of 8 (sublane
    rule) unless it is the full batch, and (c) keeps a double-buffered x tile
    under a conservative budget (safe for v5e 16 MiB / v7x 32 MiB scoped VMEM)."""
    if batch % 8 != 0:
        return batch                      # single full-batch block (full-dim ok)
    bytes_per_row = n * d * 4
    max_rows = max(8, vmem_budget_bytes // (2 * bytes_per_row))
    best = 8
    for cand in range(8, batch + 1, 8):
        if batch % cand == 0 and cand <= max_rows:
            best = cand
    return best


def sentence_classification_forward(top_vecs, mask, params, *, batch_tile=None):
    B, N, D = top_vecs.shape
    maskf = mask.astype(jnp.float32)
    pos = params["pe"][:N]                                          # (N, D)

    tb = batch_tile if batch_tile is not None else _pick_batch_tile(B, N, D)
    assert B % tb == 0
    grid = (B // tb,)

    sent_scores = pl.pallas_call(
        sent_cls_kernel,
        out_shape=jax.ShapeDtypeStruct((B, N), jnp.float32),
        grid=grid,
        in_specs=[
            pl.BlockSpec((tb, N, D), lambda i: (i, 0, 0)),          # x: batch-tiled
            pl.BlockSpec((tb, N, 1), lambda i: (i, 0, 0)),          # mask (input mul)
            pl.BlockSpec((tb, N), lambda i: (i, 0)),                # mask (output mul)
            pl.BlockSpec((N, D), lambda i: (0, 0)),                 # pe: pinned
            pl.BlockSpec((1, D), lambda i: (0, 0)),                 # ln gamma: pinned
            pl.BlockSpec((1, D), lambda i: (0, 0)),                 # ln beta: pinned
            pl.BlockSpec((1, D), lambda i: (0, 0)),                 # wo.weight: pinned
            pl.BlockSpec(memory_space=pltpu.MemorySpace.SMEM),      # wo.bias scalar
        ],
        out_specs=pl.BlockSpec((tb, N), lambda i: (i, 0)),          # lane-dense scores
        compiler_params=pltpu.CompilerParams(
            dimension_semantics=("parallel",)),
    )(top_vecs, maskf[:, :, None], maskf, pos,
      params["ln_g"], params["ln_b"], params["wo_w"], params["wo_b"])

    return sent_scores                                              # (B, N)


def make_positional_encoding(max_len, d):
    position = jnp.arange(max_len, dtype=jnp.float32)[:, None]
    div_term = jnp.exp(jnp.arange(0, d, 2, dtype=jnp.float32)
                       * -(math.log(10000.0) / d))
    pe = jnp.zeros((max_len, d), dtype=jnp.float32)
    pe = pe.at[:, 0::2].set(jnp.sin(position * div_term))
    pe = pe.at[:, 1::2].set(jnp.cos(position * div_term))
    return pe


def init_params(key, d_model, max_len=64):
    k_w, k_b, k_g, k_be = jax.random.split(key, 4)
    bound = 1.0 / math.sqrt(d_model)
    return {
        "pe": make_positional_encoding(max_len, d_model),
        # randomized (not ones/zeros) so the affine part is actually tested
        "ln_g": 1.0 + 0.1 * jax.random.normal(k_g, (1, d_model), jnp.float32),
        "ln_b": 0.1 * jax.random.normal(k_be, (1, d_model), jnp.float32),
        "wo_w": jax.random.uniform(k_w, (1, d_model), jnp.float32, -bound, bound),
        "wo_b": jax.random.uniform(k_b, (1,), jnp.float32, -bound, bound),
    }


def reference_forward(top_vecs, mask, params):
    N = top_vecs.shape[1]
    mf = mask.astype(jnp.float32)
    x = top_vecs * mf[:, :, None] + params["pe"][:N][None]
    mu = jnp.mean(x, axis=-1, keepdims=True)
    var = jnp.mean(jnp.square(x - mu), axis=-1, keepdims=True)
    xn = (x - mu) / jnp.sqrt(var + 1e-6)
    xn = xn * params["ln_g"][0] + params["ln_b"][0]
    scores = jnp.sum(xn * params["wo_w"][0], axis=-1) + params["wo_b"][0]
    return jax.nn.sigmoid(scores) * mf


if __name__ == "__main__":
    B, N, D = 16, 8, 32

    key = jax.random.PRNGKey(0)
    k_param, k_x, k_mask = jax.random.split(key, 3)

    params = init_params(k_param, D, max_len=64)
    top_vecs = jax.random.normal(k_x, (B, N, D), jnp.float32)
    # 0/1 mask like the PyTorch module; mask out the tail of a couple of rows.
    mask = jnp.ones((B, N), dtype=jnp.int32)
    mask = mask.at[1, N - 3:].set(0)
    mask = mask.at[5, N - 5:].set(0)

    # batch_tile=8 -> grid=(2,) so the tiled/pinned path is actually exercised.
    scores = sentence_classification_forward(top_vecs, mask, params, batch_tile=8)
    jax.block_until_ready(scores)

    ref = reference_forward(top_vecs, mask, params)
    assert scores.shape == (B, N)
    assert jnp.allclose(scores, ref, atol=1e-5, rtol=1e-5)

    print("KERNEL_OK")
</pallas_src>

<mosaic_0001>
module attributes {stable_mosaic.version = 11 : i64} {
  func.func @sent_cls_kernel(%arg0: i32, %arg1: memref<8x8x32xf32, #tpu.memory_space<vmem>>, %arg2: memref<8x8x1xf32, #tpu.memory_space<vmem>>, %arg3: memref<8x8xf32, #tpu.memory_space<vmem>>, %arg4: memref<8x32xf32, #tpu.memory_space<vmem>>, %arg5: memref<1x32xf32, #tpu.memory_space<vmem>>, %arg6: memref<1x32xf32, #tpu.memory_space<vmem>>, %arg7: memref<1x32xf32, #tpu.memory_space<vmem>>, %arg8: memref<1xf32, #tpu.memory_space<smem>>, %arg9: memref<8x8xf32, #tpu.memory_space<vmem>>) attributes {dimension_semantics = [#tpu.dimension_semantics<parallel>], iteration_bounds = array<i64: 2>, scalar_prefetch = 0 : i64, scratch_operands = 0 : i64, tpu.core_type = #tpu.core_type<tc>, window_params = [{transform_indices = @transform_0, window_bounds = array<i64: 8, 8, 32>}, {transform_indices = @transform_1, window_bounds = array<i64: 8, 8, 1>}, {transform_indices = @transform_2, window_bounds = array<i64: 8, 8>}, {pipeline_mode = #tpu.pipeline_mode<synchronous>, transform_indices = @transform_3, window_bounds = array<i64: 8, 32>}, {pipeline_mode = #tpu.pipeline_mode<synchronous>, transform_indices = @transform_4, window_bounds = array<i64: 1, 32>}, {pipeline_mode = #tpu.pipeline_mode<synchronous>, transform_indices = @transform_5, window_bounds = array<i64: 1, 32>}, {pipeline_mode = #tpu.pipeline_mode<synchronous>, transform_indices = @transform_6, window_bounds = array<i64: 1, 32>}, {transform_indices = @transform_7, window_bounds = array<i64: 1>}, {transform_indices = @transform_8, window_bounds = array<i64: 8, 8>}]} {
    %c0 = arith.constant 0 : index
    %c0_0 = arith.constant 0 : index
    %c0_1 = arith.constant 0 : index
    %0 = vector.load %arg1[%c0, %c0_0, %c0_1] : memref<8x8x32xf32, #tpu.memory_space<vmem>>, vector<8x8x32xf32>
    %c0_2 = arith.constant 0 : index
    %c0_3 = arith.constant 0 : index
    %c0_4 = arith.constant 0 : index
    %1 = vector.load %arg2[%c0_2, %c0_3, %c0_4] : memref<8x8x1xf32, #tpu.memory_space<vmem>>, vector<8x8x1xf32>
    %2 = vector.broadcast %1 : vector<8x8x1xf32> to vector<8x8x32xf32>
    %3 = arith.mulf %0, %2 : vector<8x8x32xf32>
    %c0_5 = arith.constant 0 : index
    %c0_6 = arith.constant 0 : index
    %4 = vector.load %arg4[%c0_5, %c0_6] : memref<8x32xf32, #tpu.memory_space<vmem>>, vector<8x32xf32>
    %5 = vector.shape_cast %4 : vector<8x32xf32> to vector<1x8x32xf32>
    %6 = vector.broadcast %5 : vector<1x8x32xf32> to vector<8x8x32xf32>
    %7 = arith.addf %3, %6 : vector<8x8x32xf32>
    %cst = arith.constant dense<0.000000e+00> : vector<8x8xf32>
    %8 = vector.multi_reduction <add>, %7, %cst [2] : vector<8x8x32xf32> to vector<8x8xf32>
    %9 = vector.shape_cast %8 : vector<8x8xf32> to vector<8x8x1xf32>
    %cst_7 = arith.constant 3.200000e+01 : f32
    %10 = vector.broadcast %cst_7 : f32 to vector<8x8x1xf32>
    %11 = arith.divf %9, %10 : vector<8x8x1xf32>
    %12 = vector.broadcast %11 : vector<8x8x1xf32> to vector<8x8x32xf32>
    %13 = arith.subf %7, %12 : vector<8x8x32xf32>
    %14 = arith.mulf %13, %13 : vector<8x8x32xf32>
    %cst_8 = arith.constant dense<0.000000e+00> : vector<8x8xf32>
    %15 = vector.multi_reduction <add>, %14, %cst_8 [2] : vector<8x8x32xf32> to vector<8x8xf32>
    %16 = vector.shape_cast %15 : vector<8x8xf32> to vector<8x8x1xf32>
    %cst_9 = arith.constant 3.200000e+01 : f32
    %17 = vector.broadcast %cst_9 : f32 to vector<8x8x1xf32>
    %18 = arith.divf %16, %17 : vector<8x8x1xf32>
    %19 = vector.broadcast %11 : vector<8x8x1xf32> to vector<8x8x32xf32>
    %20 = arith.subf %7, %19 : vector<8x8x32xf32>
    %cst_10 = arith.constant 9.99999997E-7 : f32
    %21 = vector.broadcast %cst_10 : f32 to vector<8x8x1xf32>
    %22 = arith.addf %18, %21 : vector<8x8x1xf32>
    %23 = math.rsqrt %22 : vector<8x8x1xf32>
    %24 = vector.broadcast %23 : vector<8x8x1xf32> to vector<8x8x32xf32>
    %25 = arith.mulf %20, %24 : vector<8x8x32xf32>
    %c0_11 = arith.constant 0 : index
    %c0_12 = arith.constant 0 : index
    %26 = vector.load %arg5[%c0_11, %c0_12] : memref<1x32xf32, #tpu.memory_space<vmem>>, vector<1x32xf32>
    %27 = vector.shape_cast %26 : vector<1x32xf32> to vector<1x1x32xf32>
    %28 = vector.broadcast %27 : vector<1x1x32xf32> to vector<8x8x32xf32>
    %29 = arith.mulf %25, %28 : vector<8x8x32xf32>
    %c0_13 = arith.constant 0 : index
    %c0_14 = arith.constant 0 : index
    %30 = vector.load %arg6[%c0_13, %c0_14] : memref<1x32xf32, #tpu.memory_space<vmem>>, vector<1x32xf32>
    %31 = vector.shape_cast %30 : vector<1x32xf32> to vector<1x1x32xf32>
    %32 = vector.broadcast %31 : vector<1x1x32xf32> to vector<8x8x32xf32>
    %33 = arith.addf %29, %32 : vector<8x8x32xf32>
    %c0_15 = arith.constant 0 : index
    %c0_16 = arith.constant 0 : index
    %34 = vector.load %arg7[%c0_15, %c0_16] : memref<1x32xf32, #tpu.memory_space<vmem>>, vector<1x32xf32>
    %35 = vector.shape_cast %34 : vector<1x32xf32> to vector<1x1x32xf32>
    %36 = vector.broadcast %35 : vector<1x1x32xf32> to vector<8x8x32xf32>
    %37 = arith.mulf %33, %36 : vector<8x8x32xf32>
    %cst_17 = arith.constant dense<0.000000e+00> : vector<8x8xf32>
    %38 = vector.multi_reduction <add>, %37, %cst_17 [2] : vector<8x8x32xf32> to vector<8x8xf32>
    %c0_18 = arith.constant 0 : index
    %39 = memref.load %arg8[%c0_18] : memref<1xf32, #tpu.memory_space<smem>>
    %40 = vector.broadcast %39 : f32 to vector<8x8xf32>
    %41 = arith.addf %38, %40 : vector<8x8xf32>
    %42 = arith.negf %41 : vector<8x8xf32>
    %43 = math.exp %42 : vector<8x8xf32>
    %cst_19 = arith.constant 1.000000e+00 : f32
    %44 = vector.broadcast %cst_19 : f32 to vector<8x8xf32>
    %45 = arith.addf %44, %43 : vector<8x8xf32>
    %46 = arith.divf %44, %45 : vector<8x8xf32>
    %c0_20 = arith.constant 0 : index
    %c0_21 = arith.constant 0 : index
    %47 = vector.load %arg3[%c0_20, %c0_21] : memref<8x8xf32, #tpu.memory_space<vmem>>, vector<8x8xf32>
    %48 = arith.mulf %46, %47 : vector<8x8xf32>
    %c0_22 = arith.constant 0 : index
    %c0_23 = arith.constant 0 : index
    %49 = vector.load %arg9[%c0_22, %c0_23] : memref<8x8xf32, #tpu.memory_space<vmem>>, vector<8x8xf32>
    tpu.vector_store %arg9[%c0_22, %c0_23], %48 {strides = array<i32>} : memref<8x8xf32, #tpu.memory_space<vmem>>, vector<8x8xf32>,
    return
  }
  func.func @transform_0(%arg0: i32) -> (i32, i32, i32) {
    %c0_i32 = arith.constant 0 : i32
    %c0_i32_0 = arith.constant 0 : i32
    %c0_i32_1 = arith.constant 0 : i32
    return %arg0, %c0_i32, %c0_i32_0 : i32, i32, i32
  }
  func.func @transform_1(%arg0: i32) -> (i32, i32, i32) {
    %c0_i32 = arith.constant 0 : i32
    %c0_i32_0 = arith.constant 0 : i32
    %c0_i32_1 = arith.constant 0 : i32
    return %arg0, %c0_i32, %c0_i32_0 : i32, i32, i32
  }
  func.func @transform_2(%arg0: i32) -> (i32, i32) {
    %c0_i32 = arith.constant 0 : i32
    %c0_i32_0 = arith.constant 0 : i32
    return %arg0, %c0_i32 : i32, i32
  }
  func.func @transform_3(%arg0: i32) -> (i32, i32) {
    %c0_i32 = arith.constant 0 : i32
    %c0_i32_0 = arith.constant 0 : i32
    %c0_i32_1 = arith.constant 0 : i32
    return %c0_i32, %c0_i32_0 : i32, i32
  }
  func.func @transform_4(%arg0: i32) -> (i32, i32) {
    %c0_i32 = arith.constant 0 : i32
    %c0_i32_0 = arith.constant 0 : i32
    %c0_i32_1 = arith.constant 0 : i32
    return %c0_i32, %c0_i32_0 : i32, i32
  }
  func.func @transform_5(%arg0: i32) -> (i32, i32) {
    %c0_i32 = arith.constant 0 : i32
    %c0_i32_0 = arith.constant 0 : i32
    %c0_i32_1 = arith.constant 0 : i32
    return %c0_i32, %c0_i32_0 : i32, i32
  }
  func.func @transform_6(%arg0: i32) -> (i32, i32) {
    %c0_i32 = arith.constant 0 : i32
    %c0_i32_0 = arith.constant 0 : i32
    %c0_i32_1 = arith.constant 0 : i32
    return %c0_i32, %c0_i32_0 : i32, i32
  }
  func.func @transform_7(%arg0: i32) -> i32 {
    %c0_i32 = arith.constant 0 : i32
    %c0_i32_0 = arith.constant 0 : i32
    return %c0_i32 : i32
  }
  func.func @transform_8(%arg0: i32) -> (i32, i32) {
    %c0_i32 = arith.constant 0 : i32
    %c0_i32_0 = arith.constant 0 : i32
    return %arg0, %c0_i32 : i32, i32
  }
}

</mosaic_0001>

<bundles_post_ra>
// kernel: tpu_custom_call.1
= control target key start
LH: loop header
LB: loop body
LE: loop exit
PB: predicated region body
PF: predicated region fallthrough
CT: control target
= control target key end

     0   :  { %s1026_s29 = smov 0   ;;  %s1160_s0 = inlined_call_operand.vmem [shape: f32[16,8,32], index: 0, kind: input, shape index: {}]   ;;  %s1161_s1 = inlined_call_operand.vmem [shape: f32[16,8,1], index: 1, kind: input, shape index: {}]   ;;  %s1162_s2 = inlined_call_operand.vmem [shape: f32[16,8], index: 2, kind: input, shape index: {}]   ;;  %s1163_s3 = inlined_call_operand.vmem [shape: f32[8,32], index: 3, kind: input, shape index: {}]   ;;  %s1164_s4 = inlined_call_operand.vmem [shape: f32[1,32], index: 4, kind: input, shape index: {}]   ;;  %s1165_s5 = inlined_call_operand.vmem [shape: f32[1,32], index: 5, kind: input, shape index: {}]   ;;  %s1166_s6 = inlined_call_operand.vmem [shape: f32[1,32], index: 6, kind: input, shape index: {}]   ;;  %s1167_s7 = inlined_call_operand.<no memory space> [shape: f32[1], index: 7, kind: input, shape index: {}]   ;;  %s1168_s8 = inlined_call_operand.vmem [shape: f32[16,8], index: 8, kind: output, shape index: {}]  }
   0x1   :  { %13 = sst [smem:[#allocation2]] %s1167_s7 }
   0x2 LB: > { %s1032_s30 = sadd.s32 4294967295, %s975_s29   ;;  %p890_p0 = scmp.ge.s32.totalorder %s975_s29, 1  ;;  %s975_s29 = sphi %s1026_s29, %s19_s29  }
   0x3   : > { %p284_p1 = scmp.lt.s32.totalorder %s975_s29, 3 }
   0x5   : > { %p285_p2 = pnand %p890_p0, %p284_p1 }
   0x6   : > { %s891_s9 = sshll.u32 (!%p285_p2), %s1032_s30, 3  ;;  %p338_p4 = scmp.lt.s32.totalorder (!%p285_p2), %s1032_s30, 1 }
   0x7   : > { %288 = sbr.rel (%p285_p2) target bundleno = 774 (0x306), region = 52  ;;  %p327_p3 = scmp.lt.s32.totalorder (!%p285_p2), %s891_s9, 15 }
   0x8   : > { %s594_s28 = sld [smem:[#allocation2]] (!%p285_p2) }
   0xc   : > { %v977_v0 = vmov 0   ;;  %s1170_s9 = smov (!%p327_p3, %s891_s9), 15  ;;  %v410_v13 = vld [vmem:[%s1163_s3] sm:$0xff]  ;;  %vm419_vm0 = vcmask 261120   ;;  %s1172_s30 = smov (!%p338_p4, %s1032_s30), 1  ;;  %vm792_vm1 = vcmask 1041409  }
   0xd   : > { %920 = vset.pattern.permute.xlu1 %v977_v0  ;;  %919 = vset.pattern.permute.xlu0 %v977_v0  ;;  %s892_s7 = sshll.u32 %s1170_s9, 3  ;;  %s895_s24 = sshll.u32 %s1172_s30, 3  ;;  %vm794_vm2 = vcmask 1042434   ;;  %vm796_vm3 = vcmask 1043459   ;;  %vm798_vm4 = vcmask 1044484   ;;  %vm800_vm5 = vcmask 1045509  }
   0xe   : > { %s336_s12 = scalar_lea.vmem %s1161_s1, %s892_s7  ;;  %s1043_s15 = scalar_lea.vmem %s1160_s0, %s892_s7  ;;  %vm802_vm6 = vcmask 1046534   ;;  %vm804_vm7 = vcmask 1047559   ;;  %vm807_vm8 = vcmask 64512  }
   0xf   : > { %v356_v1 = vld [vmem:[%s336_s12 + $0x10] sm:$0xff]  ;;  %v354_v2 = vld [vmem:[%s336_s12] sm:$0xff]  ;;  %v357_v3 = vld [vmem:[%s336_s12 + $0x18] sm:$0xff]  ;;  %s341_s27 = scalar_lea.vmem %s1162_s2, %s895_s24  ;;  %s345_s10 = scalar_lea.vmem %s1168_s8, %s895_s24 }
  0x10   : > { %374 = vperm.xlu1 %920, %v356_v1   ;;  %364 = vperm.xlu0 %919, %v354_v2   ;;  %v355_v4 = vld [vmem:[%s336_s12 + $0x8] sm:$0xff]  ;;  %v358_v6 = vld [vmem:[%s336_s12 + $0x20] sm:$0xff]  ;;  %v361_v7 = vld [vmem:[%s336_s12 + $0x38] sm:$0xff] }
  0x11   : > { %v359_v5 = vld [vmem:[%s336_s12 + $0x28] sm:$0xff]  ;;  %v360_v8 = vld [vmem:[%s336_s12 + $0x30] sm:$0xff]  ;;  %v346_v10 = vld [vmem:[%s1043_s15] sm:$0xff] }
  0x12   : > { %v348_v9 = vld [vmem:[%s1043_s15 + $0x10] sm:$0xff]  ;;  %v349_v16 = vld [vmem:[%s1043_s15 + $0x18] sm:$0xff]  ;;  %v347_v17 = vld [vmem:[%s1043_s15 + $0x8] sm:$0xff] }
  0x13   : > { %v351_v25 = vld [vmem:[%s1043_s15 + $0x28] sm:$0xff]  ;;  %v350_v26 = vld [vmem:[%s1043_s15 + $0x20] sm:$0xff]  ;;  %v353_v35 = vld [vmem:[%s1043_s15 + $0x38] sm:$0xff] }
  0x14   : > { %379 = vperm.xlu1 %920, %v357_v3   ;;  %369 = vperm.xlu0 %919, %v355_v4   ;;  %v352_v36 = vld [vmem:[%s1043_s15 + $0x30] sm:$0xff] }
  0x18   : > { %389 = vperm.xlu1 %920, %v359_v5   ;;  %384 = vperm.xlu0 %919, %v358_v6  }
  0x1c   : > { %399 = vperm.xlu1 %920, %v361_v7   ;;  %394 = vperm.xlu0 %919, %v360_v8  }
  0x8b   : > { %v375_v11 = vpop.permute.xlu1 %374  ;;  %v365_v12 = vpop.permute.xlu0 %364 }
  0x8c   : > { %v404_v14 = vmul.f32 %v375_v11, %v348_v9  ;;  %v402_v15 = vmul.f32 %v365_v12, %v346_v10 }
  0x8e   : > { %v411_v18 = vadd.f32 %v410_v13, %v402_v15  ;;  %v413_v19 = vadd.f32 %v410_v13, %v404_v14 }
  0x8f   : > { %v380_v20 = vpop.permute.xlu1 %379  ;;  %v370_v21 = vpop.permute.xlu0 %369 }
  0x90   : > { %v405_v22 = vmul.f32 %v380_v20, %v349_v16  ;;  %v403_v23 = vmul.f32 %v370_v21, %v347_v17  ;;  %v420_v24 = vsel %vm419_vm0, %v411_v18, 0.0  ;;  %v426_v28 = vsel %vm419_vm0, %v413_v19, 0.0 }
  0x91   : > { %421 = vadd.xlane.f32.xlu0 %v420_v24 }
  0x92   : > { %v412_v27 = vadd.f32 %v410_v13, %v403_v23  ;;  %v414_v31 = vadd.f32 %v410_v13, %v405_v22 }
  0x93   : > { %v390_v29 = vpop.permute.xlu1 %389  ;;  %v385_v30 = vpop.permute.xlu0 %384 }
  0x94   : > { %v407_v32 = vmul.f32 %v390_v29, %v351_v25  ;;  %v406_v33 = vmul.f32 %v385_v30, %v350_v26  ;;  %v423_v34 = vsel %vm419_vm0, %v412_v27, 0.0  ;;  %v429_v40 = vsel %vm419_vm0, %v414_v31, 0.0 }
  0x95   : > { %424 = vadd.xlane.f32.xlu1 %v423_v34  ;;  %427 = vadd.xlane.f32.xlu0 %v426_v28 }
  0x96   : > { %v415_v37 = vadd.f32 %v410_v13, %v406_v33  ;;  %v416_v44 = vadd.f32 %v410_v13, %v407_v32 }
  0x97   : > { %v400_v38 = vpop.permute.xlu1 %399  ;;  %v395_v39 = vpop.permute.xlu0 %394 }
  0x98   : > { %v409_v41 = vmul.f32 %v400_v38, %v353_v35  ;;  %v408_v42 = vmul.f32 %v395_v39, %v352_v36  ;;  %v432_v43 = vsel %vm419_vm0, %v415_v37, 0.0  ;;  %v435_v47 = vsel %vm419_vm0, %v416_v44, 0.0 }
  0x99   : > { %433 = vadd.xlane.f32.xlu1 %v432_v43  ;;  %430 = vadd.xlane.f32.xlu0 %v429_v40 }
  0x9a   : > { %v417_v45 = vadd.f32 %v410_v13, %v408_v42  ;;  %v418_v48 = vadd.f32 %v410_v13, %v409_v41 }
  0x9c   : > { %v438_v46 = vsel %vm419_vm0, %v417_v45, 0.0  ;;  %v441_v49 = vsel %vm419_vm0, %v418_v48, 0.0 }
  0x9d   : > { %439 = vadd.xlane.f32.xlu1 %v438_v46  ;;  %436 = vadd.xlane.f32.xlu0 %v435_v47 }
  0xa1   : > { %442 = vadd.xlane.f32.xlu0 %v441_v49 }
 0x11a   : > { %v422_v50 = vpop.xlane.xlu0 %421 }
 0x11b   : > { %v445_v51 = vmul.f32 0.03125, %v422_v50  ;;  %v897_v50 = vld [vmem:[%s1164_s4] ss:$0 sm:$0xff] }
 0x11d   : > { %v1064_v52 = vsub.f32 %v411_v18, %v445_v51 }
 0x11e   : > { %v425_v53 = vpop.xlane.xlu1 %424  ;;  %v428_v54 = vpop.xlane.xlu0 %427 }
 0x11f   : > { %v446_v55 = vmul.f32 0.03125, %v425_v53  ;;  %v447_v56 = vmul.f32 0.03125, %v428_v54  ;;  %v461_v57 = vmul.f32 %v1064_v52, %v1064_v52  ;;  %v898_v54 = vld [vmem:[%s1165_s5] ss:$0 sm:$0xff] }
 0x121   : > { %v1068_v58 = vsub.f32 %v412_v27, %v446_v55  ;;  %v1070_v59 = vsub.f32 %v413_v19, %v447_v56  ;;  %v469_v60 = vsel %vm419_vm0, %v461_v57, 0.0  ;;  %v899_v57 = vld [vmem:[%s1166_s6] ss:$0 sm:$0xff] }
 0x122   : > { %v434_v61 = vpop.xlane.xlu1 %433  ;;  %470 = vadd.xlane.f32.xlu1 %v469_v60  ;;  %v431_v62 = vpop.xlane.xlu0 %430 }
 0x123   : > { %v449_v63 = vmul.f32 0.03125, %v434_v61  ;;  %v448_v0 = vmul.f32 0.03125, %v431_v62  ;;  %v462_v1 = vmul.f32 %v1068_v58, %v1068_v58  ;;  %v463_v2 = vmul.f32 %v1070_v59, %v1070_v59 }
 0x125   : > { %v1077_v3 = vsub.f32 %v415_v37, %v449_v63  ;;  %v1079_v4 = vsub.f32 %v414_v31, %v448_v0  ;;  %v472_v5 = vsel %vm419_vm0, %v462_v1, 0.0  ;;  %v475_v6 = vsel %vm419_vm0, %v463_v2, 0.0 }
 0x126   : > { %v440_v7 = vpop.xlane.xlu1 %439  ;;  %473 = vadd.xlane.f32.xlu0 %v472_v5  ;;  %476 = vadd.xlane.f32.xlu1 %v475_v6  ;;  %v437_v8 = vpop.xlane.xlu0 %436 }
 0x127   : > { %v451_v9 = vmul.f32 0.03125, %v440_v7  ;;  %v450_v10 = vmul.f32 0.03125, %v437_v8  ;;  %v465_v11 = vmul.f32 %v1077_v3, %v1077_v3  ;;  %v464_v12 = vmul.f32 %v1079_v4, %v1079_v4 }
 0x129   : > { %v1087_v13 = vsub.f32 %v417_v45, %v451_v9  ;;  %v1089_v14 = vsub.f32 %v416_v44, %v450_v10  ;;  %v481_v15 = vsel %vm419_vm0, %v465_v11, 0.0  ;;  %v478_v16 = vsel %vm419_vm0, %v464_v12, 0.0 }
 0x12a   : > { %482 = vadd.xlane.f32.xlu1 %v481_v15  ;;  %479 = vadd.xlane.f32.xlu0 %v478_v16  ;;  %v443_v17 = vpop.xlane.xlu0 %442 }
 0x12b   : > { %v452_v18 = vmul.f32 0.03125, %v443_v17  ;;  %v467_v19 = vmul.f32 %v1087_v13, %v1087_v13  ;;  %v466_v20 = vmul.f32 %v1089_v14, %v1089_v14 }
 0x12d   : > { %v1097_v21 = vsub.f32 %v418_v48, %v452_v18  ;;  %v487_v22 = vsel %vm419_vm0, %v467_v19, 0.0  ;;  %v484_v23 = vsel %vm419_vm0, %v466_v20, 0.0 }
 0x12e   : > { %488 = vadd.xlane.f32.xlu1 %v487_v22  ;;  %485 = vadd.xlane.f32.xlu0 %v484_v23 }
 0x12f   : > { %v468_v24 = vmul.f32 %v1097_v21, %v1097_v21 }
 0x131   : > { %v490_v25 = vsel %vm419_vm0, %v468_v24, 0.0 }
 0x132   : > { %491 = vadd.xlane.f32.xlu0 %v490_v25 }
 0x1ab   : > { %v471_v26 = vpop.xlane.xlu1 %470 }
 0x1ac   : > { %v493_v27 = vmul.f32 0.03125, %v471_v26 }
 0x1ae   : > { %v501_v28 = vadd.f32 1e-06, %v493_v27 }
 0x1af   : > { %v477_v29 = vpop.xlane.xlu1 %476  ;;  %v474_v30 = vpop.xlane.xlu0 %473 }
 0x1b0   : > { %921 = vrsqrt.f32 %v501_v28  ;;  %v495_v31 = vmul.f32 0.03125, %v477_v29  ;;  %v494_v32 = vmul.f32 0.03125, %v474_v30 }
 0x1b2   : > { %v503_v33 = vadd.f32 1e-06, %v495_v31  ;;  %v502_v34 = vadd.f32 1e-06, %v494_v32 }
 0x1b3   : > { %v483_v35 = vpop.xlane.xlu1 %482  ;;  %v480_v36 = vpop.xlane.xlu0 %479 }
 0x1b4   : > { %923 = vrsqrt.f32 %v503_v33  ;;  %v497_v37 = vmul.f32 0.03125, %v483_v35  ;;  %v496_v38 = vmul.f32 0.03125, %v480_v36  ;;  %v654_v36 = vlaneseq }
 0x1b5   : > { %925 = vrsqrt.f32 %v502_v34 }
 0x1b6   : > { %v505_v39 = vadd.f32 1e-06, %v497_v37  ;;  %v504_v40 = vadd.f32 1e-06, %v496_v38  ;;  %v1135_v38 = vshrl.u32 %v654_v36, 7 }
 0x1b7   : > { %v489_v41 = vpop.xlane.xlu1 %488  ;;  %v486_v42 = vpop.xlane.xlu0 %485 }
 0x1b8   : > { %927 = vrsqrt.f32 %v505_v39  ;;  %v499_v43 = vmul.f32 0.03125, %v489_v41  ;;  %v498_v44 = vmul.f32 0.03125, %v486_v42  ;;  %v656_v39 = vsub.s32 0, %v1135_v38 }
 0x1b9   : > { %929 = vrsqrt.f32 %v504_v40  ;;  %v652_v40 = vld [vmem:[%s341_s27] sm:$0xff]  ;;  %v670_v42 = vsub.s32 2, %v1135_v38 }
 0x1ba   : > { %v507_v45 = vadd.f32 1e-06, %v499_v43  ;;  %v506_v46 = vadd.f32 1e-06, %v498_v44  ;;  %v657_v41 = vrot.slane %v652_v40, %v656_v39  ;;  %v677_v44 = vsub.s32 3, %v1135_v38 }
 0x1bb   : > { %v492_v47 = vpop.xlane.xlu0 %491  ;;  %v671_v43 = vrot.slane %v652_v40, %v670_v42 }
 0x1bc   : > { %931 = vrsqrt.f32 %v507_v45  ;;  %v500_v48 = vmul.f32 0.03125, %v492_v47  ;;  %v663_v45 = vsub.s32 1, %v1135_v38  ;;  %v691_v47 = vsub.s32 5, %v1135_v38 }
 0x1bd   : > { %v922_v49 = vpop.eup %921  ;;  %933 = vrsqrt.f32 %v506_v46  ;;  %v678_v46 = vrot.slane %v652_v40, %v677_v44 }
 0x1be   : > { %v508_v51 = vadd.f32 1e-06, %v500_v48  ;;  %v517_v53 = vmul.f32 %v922_v49, %v1064_v52  ;;  %v664_v48 = vrot.slane %v652_v40, %v663_v45  ;;  %v684_v49 = vsub.s32 4, %v1135_v38 }
 0x1c0   : > { %935 = vrsqrt.f32 %v508_v51  ;;  %v532_v55 = vmul.f32 %v897_v50, %v517_v53  ;;  %v705_v51 = vsub.s32 7, %v1135_v38  ;;  %v685_v53 = vrot.slane %v652_v40, %v684_v49 }
 0x1c1   : > { %v924_v56 = vpop.eup %923 }
 0x1c2   : > { %v926_v60 = vpop.eup %925  ;;  %v547_v61 = vadd.f32 %v898_v54, %v532_v55  ;;  %v519_v62 = vmul.f32 %v924_v56, %v1070_v59  ;;  %v706_v55 = vrot.slane %v652_v40, %v705_v51 }
 0x1c3   : > { %v518_v63 = vmul.f32 %v926_v60, %v1068_v58 }
 0x1c4   : > { %v562_v0 = vmul.f32 %v899_v57, %v547_v61  ;;  %v534_v1 = vmul.f32 %v897_v50, %v519_v62 }
 0x1c5   : > { %v928_v52 = vpop.eup %927  ;;  %v533_v2 = vmul.f32 %v897_v50, %v518_v63 }
 0x1c6   : > { %v930_v5 = vpop.eup %929  ;;  %v570_v6 = vsel %vm419_vm0, %v562_v0, 0.0  ;;  %v549_v7 = vadd.f32 %v898_v54, %v534_v1  ;;  %v521_v8 = vmul.f32 %v928_v52, %v1077_v3 }
 0x1c7   : > { %571 = vadd.xlane.f32.xlu1 %v570_v6  ;;  %v548_v9 = vadd.f32 %v898_v54, %v533_v2  ;;  %v520_v10 = vmul.f32 %v930_v5, %v1079_v4 }
 0x1c8   : > { %v564_v11 = vmul.f32 %v899_v57, %v549_v7  ;;  %v536_v12 = vmul.f32 %v897_v50, %v521_v8 }
 0x1c9   : > { %v932_v15 = vpop.eup %931  ;;  %v563_v59 = vmul.f32 %v899_v57, %v548_v9  ;;  %v535_v16 = vmul.f32 %v897_v50, %v520_v10 }
 0x1ca   : > { %v934_v58 = vpop.eup %933  ;;  %v576_v17 = vsel %vm419_vm0, %v564_v11, 0.0  ;;  %v551_v18 = vadd.f32 %v898_v54, %v536_v12  ;;  %v523_v19 = vmul.f32 %v932_v15, %v1087_v13 }
 0x1cb   : > { %577 = vadd.xlane.f32.xlu1 %v576_v17  ;;  %v573_v20 = vsel %vm419_vm0, %v563_v59, 0.0  ;;  %v550_v3 = vadd.f32 %v898_v54, %v535_v16  ;;  %v522_v22 = vmul.f32 %v934_v58, %v1089_v14 }
 0x1cc   : > { %574 = vadd.xlane.f32.xlu0 %v573_v20  ;;  %v566_v4 = vmul.f32 %v899_v57, %v551_v18  ;;  %v538_v23 = vmul.f32 %v897_v50, %v523_v19 }
 0x1cd   : > { %v936_v24 = vpop.eup %935  ;;  %v565_v25 = vmul.f32 %v899_v57, %v550_v3  ;;  %v537_v26 = vmul.f32 %v897_v50, %v522_v22 }
 0x1ce   : > { %v582_v27 = vsel %vm419_vm0, %v566_v4, 0.0  ;;  %v553_v28 = vadd.f32 %v898_v54, %v538_v23  ;;  %v524_v29 = vmul.f32 %v936_v24, %v1097_v21 }
 0x1cf   : > { %583 = vadd.xlane.f32.xlu1 %v582_v27  ;;  %v579_v13 = vsel %vm419_vm0, %v565_v25, 0.0  ;;  %v552_v30 = vadd.f32 %v898_v54, %v537_v26 }
 0x1d0   : > { %580 = vadd.xlane.f32.xlu0 %v579_v13  ;;  %v568_v31 = vmul.f32 %v899_v57, %v553_v28  ;;  %v539_v14 = vmul.f32 %v897_v50, %v524_v29  ;;  %v692_v50 = vrot.slane %v652_v40, %v691_v47 }
 0x1d1   : > { %v567_v32 = vmul.f32 %v899_v57, %v552_v30 }
 0x1d2   : > { %v588_v33 = vsel %vm419_vm0, %v568_v31, 0.0  ;;  %v554_v34 = vadd.f32 %v898_v54, %v539_v14  ;;  %v698_v54 = vsub.s32 6, %v1135_v38 }
 0x1d3   : > { %589 = vadd.xlane.f32.xlu1 %v588_v33  ;;  %v585_v35 = vsel %vm419_vm0, %v567_v32, 0.0 }
 0x1d4   : > { %586 = vadd.xlane.f32.xlu0 %v585_v35  ;;  %v569_v21 = vmul.f32 %v899_v57, %v554_v34  ;;  %v699_v56 = vrot.slane %v652_v40, %v698_v54  ;;  %v595_v57 = vstv %s594_s28 }
 0x1d6   : > { %v591_v37 = vsel %vm419_vm0, %v569_v21, 0.0 }
 0x1d8   : > { %592 = vadd.xlane.f32.xlu0 %v591_v37 }
 0x1e4   : > { %659 = vbcast.lane.b32.xlu1 %v657_v41, 256 }
 0x1e8   : > { %673 = vbcast.lane.b32.xlu1 %v671_v43, 256 }
 0x1ec   : > { %680 = vbcast.lane.b32.xlu1 %v678_v46, 256 }
 0x1ee   : > { %666 = vbcast.lane.b32.xlu0 %v664_v48, 256 }
 0x1f0   : > { %694 = vbcast.lane.b32.xlu1 %v692_v50, 256 }
 0x1f2   : > { %687 = vbcast.lane.b32.xlu0 %v685_v53, 256 }
 0x1f4   : > { %708 = vbcast.lane.b32.xlu1 %v706_v55, 256 }
 0x1f6   : > { %701 = vbcast.lane.b32.xlu0 %v699_v56, 256 }
 0x250   : > { %v572_v60 = vpop.xlane.xlu1 %571 }
 0x251   : > { %v596_v61 = vadd.f32 %v595_v57, %v572_v60 }
 0x253   : > { %v900_v62 = vmul.f32 -1.442695, %v596_v61 }
 0x254   : > { %v578_v63 = vpop.xlane.xlu1 %577 }
 0x255   : > { %937 = vpow2.f32 %v900_v62  ;;  %v598_v0 = vadd.f32 %v595_v57, %v578_v63  ;;  %v575_v1 = vpop.xlane.xlu0 %574  ;;  %v759_v62 = vand.u32 127, %v654_v36 }
 0x256   : > { %v597_v52 = vadd.f32 %v595_v57, %v575_v1 }
 0x257   : > { %v902_v2 = vmul.f32 -1.442695, %v598_v0  ;;  %v762_v0 = vsub.s32 %v759_v62, %v1135_v38 }
 0x258   : > { %v901_v5 = vmul.f32 -1.442695, %v597_v52  ;;  %v584_v6 = vpop.xlane.xlu1 %583 }
 0x259   : > { %939 = vpow2.f32 %v902_v2  ;;  %v600_v7 = vadd.f32 %v595_v57, %v584_v6  ;;  %v581_v8 = vpop.xlane.xlu0 %580 }
 0x25a   : > { %941 = vpow2.f32 %v901_v5  ;;  %v599_v9 = vadd.f32 %v595_v57, %v581_v8 }
 0x25b   : > { %v904_v10 = vmul.f32 -1.442695, %v600_v7 }
 0x25c   : > { %v903_v11 = vmul.f32 -1.442695, %v599_v9  ;;  %v590_v12 = vpop.xlane.xlu1 %589 }
 0x25d   : > { %943 = vpow2.f32 %v904_v10  ;;  %v602_v15 = vadd.f32 %v595_v57, %v590_v12  ;;  %v587_v59 = vpop.xlane.xlu0 %586 }
 0x25e   : > { %945 = vpow2.f32 %v903_v11  ;;  %v601_v16 = vadd.f32 %v595_v57, %v587_v59 }
 0x25f   : > { %v906_v58 = vmul.f32 -1.442695, %v602_v15 }
 0x260   : > { %v905_v17 = vmul.f32 -1.442695, %v601_v16  ;;  %v660_v26 = vpop.permute.xlu1 %659 }
 0x261   : > { %947 = vpow2.f32 %v906_v58  ;;  %v593_v18 = vpop.xlane.xlu0 %592 }
 0x262   : > { %v938_v19 = vpop.eup %937  ;;  %949 = vpow2.f32 %v905_v17  ;;  %v603_v20 = vadd.f32 %v595_v57, %v593_v18 }
 0x263   : > { %v628_v3 = vadd.f32 1.0, %v938_v19 }
 0x264   : > { %v907_v22 = vmul.f32 -1.442695, %v603_v20  ;;  %v674_v32 = vpop.permute.xlu1 %673 }
 0x265   : > { %951 = vrcp.f32 %v628_v3  ;;  %v667_v34 = vpop.permute.xlu0 %666 }
 0x266   : > { %v940_v4 = vpop.eup %939  ;;  %953 = vpow2.f32 %v907_v22 }
 0x267   : > { %v942_v23 = vpop.eup %941  ;;  %v630_v24 = vadd.f32 1.0, %v940_v4 }
 0x268   : > { %v629_v25 = vadd.f32 1.0, %v942_v23  ;;  %v681_v40 = vpop.permute.xlu1 %680 }
 0x269   : > { %955 = vrcp.f32 %v630_v24  ;;  %v688_v42 = vpop.permute.xlu0 %687 }
 0x26a   : > { %v944_v27 = vpop.eup %943  ;;  %957 = vrcp.f32 %v629_v25 }
 0x26b   : > { %v946_v28 = vpop.eup %945  ;;  %v632_v29 = vadd.f32 1.0, %v944_v27 }
 0x26c   : > { %v631_v13 = vadd.f32 1.0, %v946_v28  ;;  %v695_v49 = vpop.permute.xlu1 %694 }
 0x26d   : > { %959 = vrcp.f32 %v632_v29  ;;  %v702_v51 = vpop.permute.xlu0 %701 }
 0x26e   : > { %v948_v30 = vpop.eup %947  ;;  %961 = vrcp.f32 %v631_v13 }
 0x26f   : > { %v950_v31 = vpop.eup %949  ;;  %v634_v14 = vadd.f32 1.0, %v948_v30 }
 0x270   : > { %v633_v33 = vadd.f32 1.0, %v950_v31  ;;  %v709_v57 = vpop.permute.xlu1 %708 }
 0x271   : > { %963 = vrcp.f32 %v634_v14 }
 0x272   : > { %v952_v35 = vpop.eup %951  ;;  %965 = vrcp.f32 %v633_v33 }
 0x273   : > { %v954_v21 = vpop.eup %953  ;;  %v718_v37 = vmul.f32 %v952_v35, %v660_v26 }
 0x274   : > { %v635_v39 = vadd.f32 1.0, %v954_v21 }
 0x275   : > { %735 = vperm.xlu0 %919, %v718_v37  }
 0x276   : > { %v956_v41 = vpop.eup %955  ;;  %967 = vrcp.f32 %v635_v39 }
 0x277   : > { %v958_v43 = vpop.eup %957  ;;  %v720_v44 = vmul.f32 %v956_v41, %v674_v32 }
 0x278   : > { %v719_v45 = vmul.f32 %v958_v43, %v667_v34 }
 0x279   : > { %741 = vperm.xlu0 %919, %v720_v44  }
 0x27a   : > { %v960_v46 = vpop.eup %959  ;;  %738 = vperm.xlu1 %920, %v719_v45  }
 0x27b   : > { %v962_v47 = vpop.eup %961  ;;  %v722_v48 = vmul.f32 %v960_v46, %v688_v42 }
 0x27c   : > { %v721_v50 = vmul.f32 %v962_v47, %v681_v40 }
 0x27d   : > { %747 = vperm.xlu0 %919, %v722_v48  }
 0x27e   : > { %v964_v53 = vpop.eup %963  ;;  %744 = vperm.xlu1 %920, %v721_v50  }
 0x27f   : > { %v966_v54 = vpop.eup %965  ;;  %v724_v55 = vmul.f32 %v964_v53, %v702_v51 }
 0x280   : > { %v723_v56 = vmul.f32 %v966_v54, %v695_v49 }
 0x281   : > { %753 = vperm.xlu0 %919, %v724_v55  }
 0x282   : > { %750 = vperm.xlu1 %920, %v723_v56  }
 0x283   : > { %v968_v60 = vpop.eup %967 }
 0x284   : > { %v725_v61 = vmul.f32 %v968_v60, %v709_v57 }
 0x286   : > { %756 = vperm.xlu1 %920, %v725_v61  }
 0x2f0   : > { %v736_v63 = vpop.permute.xlu0 %735 }
 0x2f1   : > { %v763_v2 = vrot.slane %v736_v63, %v762_v0 }
 0x2f4   : > { %v742_v1 = vpop.permute.xlu0 %741 }
 0x2f5   : > { %v739_v52 = vpop.permute.xlu1 %738  ;;  %v771_v6 = vrot.slane %v742_v1, %v762_v0 }
 0x2f6   : > { %v767_v5 = vrot.slane %v739_v52, %v762_v0 }
 0x2f8   : > { %v793_v7 = vsel %vm792_vm1, %v767_v5, %v763_v2  ;;  %v748_v8 = vpop.permute.xlu0 %747 }
 0x2f9   : > { %v745_v9 = vpop.permute.xlu1 %744  ;;  %v795_v11 = vsel %vm794_vm2, %v771_v6, %v793_v7  ;;  %v779_v12 = vrot.slane %v748_v8, %v762_v0 }
 0x2fa   : > { %v775_v10 = vrot.slane %v745_v9, %v762_v0 }
 0x2fc   : > { %v797_v15 = vsel %vm796_vm3, %v775_v10, %v795_v11  ;;  %v754_v36 = vpop.permute.xlu0 %753 }
 0x2fd   : > { %v751_v38 = vpop.permute.xlu1 %750  ;;  %v799_v16 = vsel %vm798_vm4, %v779_v12, %v797_v15  ;;  %v787_v58 = vrot.slane %v754_v36, %v762_v0 }
 0x2fe   : > { %v783_v59 = vrot.slane %v751_v38, %v762_v0 }
 0x300   : > { %v801_v17 = vsel %vm800_vm5, %v783_v59, %v799_v16 }
 0x301   : > { %v757_v18 = vpop.permute.xlu1 %756  ;;  %v803_v20 = vsel %vm802_vm6, %v787_v58, %v801_v17 }
 0x302   : > { %v791_v19 = vrot.slane %v757_v18, %v762_v0 }
 0x304   : > { %v805_v3 = vsel %vm804_vm7, %v791_v19, %v803_v20 }
 0x305   : > { %808 = vst.msk [vmem:[%s345_s10] sm:$0xff] %vm807_vm8, %v805_v3 }
 0x306 PF: > { %s19_s29 = sadd.s32 1, %s975_s29  }
 0x307   : > { %p16_p5 = scmp.ge.s32.totalorder %s19_s29, 4  }
 0x309   :  { %18 = sbr.rel (!%p16_p5) target bundleno = 2 (0x2), region = 88 }

</bundles_post_ra>
